<compile_context>
chip_gen: v5e
topology: v5e:2x2
jax: 0.10.0
libtpu: 0.0.40
codegen_flags: <defaults>
</compile_context>

<pallas_src>
import jax
import jax.numpy as jnp
from jax.experimental import pallas as pl
from jax.experimental.pallas import tpu as pltpu

IN_FEATURES = 28 * 28          # 784
CLIENTS = 1000
HIDDEN = 1000 // CLIENTS       # 1


def _cdiv(a, b):
    return (a + b - 1) // b


def _round_up(v, m):
    return ((v + m - 1) // m) * m


def _pick_bt(batch, block_b):
    """Pick a batch tile: big enough to amortize per-step overhead, small
    enough to double-buffer in VMEM, and >=2 tiles for v7x dual-TC sharding."""
    bt = min(block_b, batch)
    # Ensure at least 2 grid tiles (v7x has 2 TensorCores) when the batch is
    # large enough that splitting does not shrink tiles below ~512 rows.
    if batch >= 1024 and _cdiv(batch, bt) < 2:
        bt = _cdiv(batch, 2)
    return max(8, _round_up(bt, 8))   # sublane-aligned


def _client_kernel(x_ref, w1_ref, scalars_ref, out_ref):
    # x_ref:       (bt, 784)    VMEM, native input dtype
    # w1_ref:      (1, 784)     VMEM, f32 fc1 weight row (resident)
    # scalars_ref: (3,)         SMEM, [b1, w2, b2] as f32
    # out_ref:     (1, 1, bt)   VMEM, lane-dense output block
    x = x_ref[...].astype(jnp.float32)            # in-kernel upcast (free VPU)
    w1 = w1_ref[...]                              # (1, 784), broadcasts over rows
    b1 = scalars_ref[0]
    w2 = scalars_ref[1]
    b2 = scalars_ref[2]

    # fc1: per-row dot product via VPU multiply + cross-lane (XLU) reduce.
    h = jnp.sum(x * w1, axis=-1)                  # (bt,)
    h = jnp.maximum(h + b1, 0.0)                  # relu(fc1(x))

    # fc2: scalar affine + relu, pure VPU.
    o = jnp.maximum(h * w2 + b2, 0.0)             # relu(fc2(.)), (bt,)

    out_ref[...] = o.reshape(out_ref.shape).astype(out_ref.dtype)


def client_forward(x, w1, b1, w2, b2, *, block_b=1024, vmem_limit_bytes=None):
    """Pallas forward pass of `Client`.

    Args:
      x:  (B, 784) activations (any float dtype; DMA'd natively, upcast in-kernel)
      w1: (784, HIDDEN) float32   (transposed PyTorch fc1.weight)
      b1: (HIDDEN,) float32
      w2: (HIDDEN, HIDDEN) float32
      b2: (HIDDEN,) float32
      block_b: batch tile size (sweepable; keep <= ~2048 on v7x unless
               vmem_limit_bytes is raised).
      vmem_limit_bytes: optional scoped-VMEM override for very large tiles.
    Returns:
      (B, HIDDEN) float32
    """
    B = x.shape[0]
    assert x.shape[1] == IN_FEATURES
    assert w1.shape[1] == HIDDEN == 1, "this kernel specializes HIDDEN == 1"

    # Cheap layout conversion only — no zero padding, no scatter.
    w1_row = w1.reshape(1, IN_FEATURES).astype(jnp.float32)
    scalars = jnp.stack([
        b1.reshape(()).astype(jnp.float32),
        w2.reshape(()).astype(jnp.float32),
        b2.reshape(()).astype(jnp.float32),
    ])  # (3,) -> SMEM

    bt = _pick_bt(B, block_b)
    num_tiles = _cdiv(B, bt)          # ragged last tile is fine: rows independent

    itemsize = jnp.dtype(x.dtype).itemsize
    cost = pl.CostEstimate(
        flops=2 * B * IN_FEATURES + 4 * B,
        transcendentals=0,
        bytes_accessed=B * IN_FEATURES * itemsize + B * 4 + IN_FEATURES * 4 + 12,
    )

    out = pl.pallas_call(
        _client_kernel,
        out_shape=jax.ShapeDtypeStruct((num_tiles, 1, bt), jnp.float32),
        grid=(num_tiles,),
        in_specs=[
            pl.BlockSpec((bt, IN_FEATURES), lambda i: (i, 0)),       # x tile (native dtype)
            pl.BlockSpec((1, IN_FEATURES), lambda i: (0, 0)),        # resident weight row
            pl.BlockSpec(memory_space=pltpu.MemorySpace.SMEM),       # [b1, w2, b2]
        ],
        out_specs=pl.BlockSpec((1, 1, bt), lambda i: (i, 0, 0)),     # lane-dense output
        compiler_params=pltpu.CompilerParams(
            dimension_semantics=("parallel",),
            vmem_limit_bytes=vmem_limit_bytes),
        cost_estimate=cost,
    )(x, w1_row, scalars)

    # Un-tile: (num_tiles, 1, bt) -> (B, 1), dropping ragged-tile padding.
    return out.reshape(num_tiles * bt)[:B].reshape(B, HIDDEN)


def _reference_forward(x, w1, b1, w2, b2):
    h = jnp.maximum(x @ w1 + b1, 0.0)
    return jnp.maximum(h @ w2 + b2, 0.0)


if __name__ == "__main__":
    key = jax.random.PRNGKey(0)
    kx, k1, k2, k3, k4, kx2, kx3 = jax.random.split(key, 7)

    # Deterministic parameter init (PyTorch-style uniform bounds, synthetic values).
    bound1 = 1.0 / (IN_FEATURES ** 0.5)
    w1 = jax.random.uniform(k1, (IN_FEATURES, HIDDEN), jnp.float32, -bound1, bound1)
    b1 = jax.random.uniform(k2, (HIDDEN,), jnp.float32, -bound1, bound1)
    bound2 = 1.0 / (HIDDEN ** 0.5)
    w2 = jax.random.uniform(k3, (HIDDEN, HIDDEN), jnp.float32, -bound2, bound2)
    b2 = jax.random.uniform(k4, (HIDDEN,), jnp.float32, -bound2, bound2)

    # 1) Small-batch check (single grid step).
    B = 8
    x = jax.random.normal(kx, (B, IN_FEATURES), dtype=jnp.float32)
    out = jax.block_until_ready(client_forward(x, w1, b1, w2, b2))
    ref = _reference_forward(x, w1, b1, w2, b2)
    assert out.shape == (B, HIDDEN)
    assert jnp.allclose(out, ref, atol=1e-5, rtol=1e-5)

    # 2) Ragged, multi-tile batch (cdiv grid with a partial last tile).
    B2 = 300
    x2 = jax.random.normal(kx2, (B2, IN_FEATURES), dtype=jnp.float32)
    out2 = jax.block_until_ready(client_forward(x2, w1, b1, w2, b2, block_b=128))
    ref2 = _reference_forward(x2, w1, b1, w2, b2)
    assert out2.shape == (B2, HIDDEN)
    assert jnp.allclose(out2, ref2, atol=1e-5, rtol=1e-5)

    # 3) bf16 activations streamed natively over HBM, upcast in-kernel.
    B3 = 64
    x3 = jax.random.normal(kx3, (B3, IN_FEATURES), dtype=jnp.float32).astype(jnp.bfloat16)
    out3 = jax.block_until_ready(client_forward(x3, w1, b1, w2, b2, block_b=32))
    ref3 = _reference_forward(x3.astype(jnp.float32), w1, b1, w2, b2)
    assert out3.shape == (B3, HIDDEN)
    assert jnp.allclose(out3, ref3, atol=1e-4, rtol=1e-4)

    print("KERNEL_OK")
</pallas_src>

<mosaic_0001>
module attributes {stable_mosaic.version = 11 : i64} {
  func.func @_client_kernel(%arg0: i32, %arg1: memref<8x784xf32, #tpu.memory_space<vmem>>, %arg2: memref<1x784xf32, #tpu.memory_space<vmem>>, %arg3: memref<3xf32, #tpu.memory_space<smem>>, %arg4: memref<1x1x8xf32, #tpu.memory_space<vmem>>) attributes {dimension_semantics = [#tpu.dimension_semantics<parallel>], iteration_bounds = array<i64: 1>, scalar_prefetch = 0 : i64, scratch_operands = 0 : i64, tpu.core_type = #tpu.core_type<tc>, window_params = [{transform_indices = @transform_0, window_bounds = array<i64: 8, 784>}, {pipeline_mode = #tpu.pipeline_mode<synchronous>, transform_indices = @transform_1, window_bounds = array<i64: 1, 784>}, {transform_indices = @transform_2, window_bounds = array<i64: 3>}, {transform_indices = @transform_3, window_bounds = array<i64: 1, 1, 8>}]} {
    %c0 = arith.constant 0 : index
    %c0_0 = arith.constant 0 : index
    %0 = vector.load %arg1[%c0, %c0_0] : memref<8x784xf32, #tpu.memory_space<vmem>>, vector<8x784xf32>
    %c0_1 = arith.constant 0 : index
    %c0_2 = arith.constant 0 : index
    %1 = vector.load %arg2[%c0_1, %c0_2] : memref<1x784xf32, #tpu.memory_space<vmem>>, vector<1x784xf32>
    %c0_3 = arith.constant 0 : index
    %2 = memref.load %arg3[%c0_3] : memref<3xf32, #tpu.memory_space<smem>>
    %c1 = arith.constant 1 : index
    %3 = memref.load %arg3[%c1] : memref<3xf32, #tpu.memory_space<smem>>
    %c2 = arith.constant 2 : index
    %4 = memref.load %arg3[%c2] : memref<3xf32, #tpu.memory_space<smem>>
    %5 = vector.broadcast %1 : vector<1x784xf32> to vector<8x784xf32>
    %6 = arith.mulf %0, %5 : vector<8x784xf32>
    %cst = arith.constant dense<0.000000e+00> : vector<8xf32>
    %7 = vector.multi_reduction <add>, %6, %cst [1] : vector<8x784xf32> to vector<8xf32>
    %8 = vector.broadcast %2 : f32 to vector<8xf32>
    %9 = arith.addf %7, %8 : vector<8xf32>
    %cst_4 = arith.constant 0.000000e+00 : f32
    %10 = vector.broadcast %cst_4 : f32 to vector<8xf32>
    %11 = arith.maximumf %9, %10 : vector<8xf32>
    %12 = vector.broadcast %3 : f32 to vector<8xf32>
    %13 = arith.mulf %11, %12 : vector<8xf32>
    %14 = vector.broadcast %4 : f32 to vector<8xf32>
    %15 = arith.addf %13, %14 : vector<8xf32>
    %cst_5 = arith.constant 0.000000e+00 : f32
    %16 = vector.broadcast %cst_5 : f32 to vector<8xf32>
    %17 = arith.maximumf %15, %16 : vector<8xf32>
    %18 = vector.shape_cast %17 : vector<8xf32> to vector<1x1x8xf32>
    %c0_6 = arith.constant 0 : index
    %c0_7 = arith.constant 0 : index
    %c0_8 = arith.constant 0 : index
    %19 = vector.load %arg4[%c0_6, %c0_7, %c0_8] : memref<1x1x8xf32, #tpu.memory_space<vmem>>, vector<1x1x8xf32>
    tpu.vector_store %arg4[%c0_6, %c0_7, %c0_8], %18 {strides = array<i32>} : memref<1x1x8xf32, #tpu.memory_space<vmem>>, vector<1x1x8xf32>,
    return
  }
  func.func @transform_0(%arg0: i32) -> (i32, i32) {
    %c0_i32 = arith.constant 0 : i32
    %c0_i32_0 = arith.constant 0 : i32
    return %arg0, %c0_i32 : i32, i32
  }
  func.func @transform_1(%arg0: i32) -> (i32, i32) {
    %c0_i32 = arith.constant 0 : i32
    %c0_i32_0 = arith.constant 0 : i32
    %c0_i32_1 = arith.constant 0 : i32
    return %c0_i32, %c0_i32_0 : i32, i32
  }
  func.func @transform_2(%arg0: i32) -> i32 {
    %c0_i32 = arith.constant 0 : i32
    %c0_i32_0 = arith.constant 0 : i32
    return %c0_i32 : i32
  }
  func.func @transform_3(%arg0: i32) -> (i32, i32, i32) {
    %c0_i32 = arith.constant 0 : i32
    %c0_i32_0 = arith.constant 0 : i32
    %c0_i32_1 = arith.constant 0 : i32
    return %arg0, %c0_i32, %c0_i32_0 : i32, i32, i32
  }
}

</mosaic_0001>

<bundles_post_ra>
// kernel: tpu_custom_call.1
= control target key start
LH: loop header
LB: loop body
LE: loop exit
PB: predicated region body
PF: predicated region fallthrough
CT: control target
= control target key end

     0   :  { %8 = vsyncpa [#allocation3], 0  ;;  %s267_s0 = inlined_call_operand.hbm [shape: f32[8,784], index: 0, kind: input, shape index: {}]   ;;  %s268_s1 = inlined_call_operand.hbm [shape: f32[1,784], index: 1, kind: input, shape index: {}]   ;;  %s269_s2 = inlined_call_operand.vmem [shape: f32[3], index: 2, kind: input, shape index: {}]   ;;  %s270_s3 = inlined_call_operand.hbm [shape: f32[1,1,8], index: 3, kind: output, shape index: {}]  }
   0x1   :  { %9 = vsyncpa [#allocation7], 0 }
   0x2   :  { %10 = vsyncpa [#allocation5], 0 }
   0x3   :  { %11 = vsyncpa [#allocation4], 0  ;;  %s17_s14 = sshll.u32 %s267_s0, 4  ;;  %s231_s15 = smov [#allocation2]   ;;  %s18_s14 = int_to_ptr.hbm [resolvable:$true] %s17_s14 }
   0x4   :  { %s19_s16 = sshll.u32 %s231_s15, 4  ;;  %s28_s19 = sshll.u32 %s268_s1, 4  ;;  %s20_s16 = int_to_ptr.vmem [resolvable:$true] %s19_s16  ;;  %s29_s19 = int_to_ptr.hbm [resolvable:$true] %s28_s19 }
   0x5   :  { %22 = dma.hbm_to_vmem [thread:$0]  %s18_s14, 896, %s20_s16, [#allocation3]  }
   0x6   :  { %s232_s20 = smov [#allocation6]   ;;  %s39_s24 = sshll.u32 %s269_s2, 4  ;;  %s40_s24 = int_to_ptr.vmem [resolvable:$true] %s39_s24 }
   0x7   :  { %s30_s21 = sshll.u32 %s232_s20, 4  ;;  %s233_s0 = smov [#allocation8]   ;;  %s31_s21 = int_to_ptr.vmem [resolvable:$true] %s30_s21 }
   0x8   :  { %33 = dma.hbm_to_vmem [thread:$0]  %s29_s19, 112, %s31_s21, [#allocation7]  }
   0x9   :  { %42 = dma.vmem_to_smem %s40_s24, 16, %s233_s0, [#allocation5]  }
   0xa   :  { %223 = dma.done.wait [#allocation3], 896  }
   0xb   :  { %224 = vsyncadd [#allocation3], 4294966400 }
   0xc   :  { %225 = dma.done.wait [#allocation7], 112  }
   0xd   :  { %226 = vsyncadd [#allocation7], 4294967184 }
   0xe   :  { %227 = dma.done.wait [#allocation5], 16  }
   0xf   :  { %228 = vsyncadd [#allocation5], 4294967280 }
  0x10   :  { %55 = sfence }
  0x11   :  { %v56_v0 = vld [vmem:[#allocation2] sm:$0xff]  ;;  %v57_v1 = vld [vmem:[#allocation2 + $0x8] sm:$0xff]  ;;  %v58_v2 = vld [vmem:[#allocation2 + $0x10] sm:$0xff]  ;;  %vm94_vm0 = vcmask 130048   ;;  %s64_s1 = sld [smem:[#allocation8]]  ;;  %v108_v34 = vlaneseq  ;;  %s234_s26 = smov [#allocation9]  }
  0x12   :  { %v63_v3 = vld [vmem:[#allocation6] sm:$0x7f]  ;;  %v60_v13 = vld [vmem:[#allocation2 + $0x20] sm:$0xff]  ;;  %v62_v15 = vld [vmem:[#allocation2 + $0x30] sm:$0xff]  ;;  %s133_s2 = sld [smem:[#allocation8 + $0x1]]  ;;  %s119_s27 = sshll.u32 %s234_s26, 4  ;;  %s120_s27 = int_to_ptr.vmem [resolvable:$true] %s119_s27 }
  0x13   :  { %v68_v4 = vperm.slane %v63_v3, 0  ;;  %v69_v5 = vperm.slane %v63_v3, 1  ;;  %v70_v6 = vperm.slane %v63_v3, 2  ;;  %v71_v7 = vperm.slane %v63_v3, 3  ;;  %v59_v8 = vld [vmem:[#allocation2 + $0x18] sm:$0xff]  ;;  %v61_v19 = vld [vmem:[#allocation2 + $0x28] sm:$0xff] }
  0x14   :  { %v72_v9 = vperm.slane %v63_v3, 4  ;;  %v74_v14 = vperm.slane %v63_v3, 6  ;;  %v73_v16 = vperm.slane %v63_v3, 5  ;;  %s134_s25 = sld [smem:[#allocation8 + $0x2]]  ;;  %v109_v38 = vand.u32 127, %v108_v34  ;;  %s121_s30 = sshll.u32 %s270_s3, 4  ;;  %s122_s30 = int_to_ptr.hbm [resolvable:$true] %s121_s30 }
  0x15   :  { %v82_v10 = vmul.f32 %v68_v4, %v56_v0  ;;  %v83_v11 = vmul.f32 %v69_v5, %v57_v1  ;;  %v84_v12 = vmul.f32 %v70_v6, %v58_v2  ;;  %v85_v17 = vmul.f32 %v71_v7, %v59_v8 }
  0x16   :  { %v86_v20 = vmul.f32 %v72_v9, %v60_v13  ;;  %v88_v22 = vmul.f32 %v74_v14, %v62_v15  ;;  %v87_v23 = vmul.f32 %v73_v16, %v61_v19  ;;  %vm112_vm1 = vcmask 57344  }
  0x17   :  { %v89_v18 = vadd.f32 %v83_v11, %v82_v10  ;;  %v99_v29 = vstv %s64_s1 }
  0x18   :  { %v95_v26 = vsel %vm94_vm0, %v88_v22, 0.0  ;;  %v102_v32 = vstv %s133_s2 }
  0x19   :  { %v90_v21 = vadd.f32 %v89_v18, %v84_v12 }
  0x1a   :  { %v104_v35 = vstv %s134_s25 }
  0x1b   :  { %v91_v24 = vadd.f32 %v90_v21, %v85_v17 }
  0x1d   :  { %v92_v25 = vadd.f32 %v91_v24, %v86_v20 }
  0x1f   :  { %v93_v27 = vadd.f32 %v92_v25, %v87_v23 }
  0x21   :  { %v96_v28 = vadd.f32 %v95_v26, %v93_v27 }
  0x23   :  { %97 = vadd.xlane.f32.xlu0 %v96_v28 }
  0x96   :  { %v98_v30 = vpop.xlane.xlu0 %97 }
  0x97   :  { %v100_v31 = vadd.f32 %v99_v29, %v98_v30 }
  0x99   :  { %v101_v33 = vmax.f32 %v100_v31, 0.0 }
  0x9b   :  { %v103_v36 = vmul.f32 %v102_v32, %v101_v33 }
  0x9d   :  { %v105_v37 = vadd.f32 %v104_v35, %v103_v36 }
  0x9f   :  { %v106_v39 = vmax.f32 %v105_v37, 0.0 }
  0xa1   :  { %v110_v40 = vperm.slane %v106_v39, %v109_v38 }
  0xa3   :  { %113 = vst.msk [vmem:[#allocation9] sm:$0x1] %vm112_vm1, %v110_v40 }
  0xa4   :  { %124 = dma.vmem_to_hbm [thread:$0]  %s120_s27, 16, %s122_s30, [#allocation4]  }
  0xa5   :  { %229 = dma.done.wait [#allocation4], 16  }
  0xa6   :  { %230 = vsyncadd [#allocation4], 4294967280 }
  0xa7   :  { %129 = vsyncpa [#allocation3], 1 }
  0xa8   :  { %130 = vsyncpa [#allocation7], 1 }
  0xa9   :  { %131 = vsyncpa [#allocation4], 1 }
  0xaa   :  { %132 = vsyncpa [#allocation5], 1 }

</bundles_post_ra>
